<compile_context>
chip_gen: v6e
topology: v6e:2x2x1
jax: 0.10.0
libtpu: 0.0.40
codegen_flags: <defaults>
</compile_context>

<pallas_src>
import functools

import jax
import jax.numpy as jnp
from jax import lax
from jax.experimental import pallas as pl
from jax.experimental.pallas import tpu as pltpu

_EPS = 1e-5  # nn.InstanceNorm2d default eps (affine=False, biased variance)


# ----------------------------- Pallas kernels --------------------------------
def _meshconv_kernel(*refs, fuse_norm: bool, residual: bool):
    """MeshConv (+ optional fused InstanceNorm / residual / ReLU).

    f_ref block: (1, 5, C, tE)  -- neighbor-slot major, channels on sublanes,
                                   EDGES on lanes.
    w_ref: (O, 5*C); b_ref: (O, 1); [r_ref: (1, O, tE)]; o_ref: (1, O, tE).
    """
    if residual:
        f_ref, w_ref, b_ref, r_ref, o_ref = refs
    else:
        f_ref, w_ref, b_ref, o_ref = refs
        r_ref = None

    f = f_ref[0]                                   # (5, C, tE), edges on lanes
    # symmetric (order-invariant) functions over the 4 neighbors (VPU, lane-dense)
    g0 = f[0]
    g1 = f[1] + f[3]
    g2 = f[2] + f[4]
    g3 = jnp.abs(f[1] - f[3])
    g4 = jnp.abs(f[2] - f[4])
    # Fuse the five per-slot matmuls into ONE MXU push, contraction depth 5*C:
    #   (O, 5C) @ (5C, tE) -> (O, tE)
    g = jnp.concatenate([g0, g1, g2, g3, g4], axis=0)                 # (5C, tE)
    acc = jnp.dot(w_ref[...], g, preferred_element_type=jnp.float32)  # (O, tE)
    acc = acc + b_ref[...]                          # (O, 1) broadcasts over lanes

    if fuse_norm:
        # InstanceNorm2d (affine=False) over the edge axis, per out-channel.
        mean = jnp.mean(acc, axis=1, keepdims=True)
        cent = acc - mean
        var = jnp.mean(cent * cent, axis=1, keepdims=True)
        acc = cent * lax.rsqrt(var + _EPS)          # rsqrt -> EUP (free slot)
        if r_ref is not None:
            acc = acc + r_ref[0]                    # residual add, then ReLU
        acc = jnp.maximum(acc, 0.0)

    o_ref[0] = acc.astype(o_ref.dtype)


def _in_relu_kernel(*refs, residual: bool):
    """Fallback: InstanceNorm2d + (residual) + ReLU on a (1, O, E) block."""
    if residual:
        x_ref, r_ref, o_ref = refs
    else:
        x_ref, o_ref = refs
        r_ref = None
    x = x_ref[0].astype(jnp.float32)                # (O, E), edges on lanes
    mean = jnp.mean(x, axis=1, keepdims=True)
    cent = x - mean
    var = jnp.mean(cent * cent, axis=1, keepdims=True)
    y = cent * lax.rsqrt(var + _EPS)
    if r_ref is not None:
        y = y + r_ref[0]
    o_ref[0] = jnp.maximum(y, 0.0).astype(o_ref.dtype)


# --------------------------- tiling / VMEM sizing -----------------------------
def _physical_vmem_bytes():
    try:
        return int(pltpu.get_tpu_info().vmem_capacity_bytes)
    except Exception:
        return 64 * 1024 * 1024  # conservative (v7x per-TC size)


def _conv_tile_bytes(C, O, tE, itemsize=4):
    f_buf = 2 * 5 * C * tE * itemsize        # double-buffered input tile
    o_buf = 2 * O * tE * itemsize            # double-buffered output tile
    w_buf = 2 * O * 5 * C * itemsize
    b_buf = 2 * O * itemsize
    return f_buf + o_buf + w_buf + b_buf


def _fused_tile_bytes(C, O, E, has_res, itemsize=4):
    extra = 2 * O * E * itemsize if has_res else 0
    return _conv_tile_bytes(C, O, E, itemsize) + extra


def _choose_tile_e(E, C, O, budget_bytes):
    # Largest multiple-of-128 edge tile that fits the VMEM budget (cap 2048);
    # small meshes use a single full-extent block (always a legal block shape).
    tE = 2048
    while tE > 128 and _conv_tile_bytes(C, O, tE) > budget_bytes:
        tE //= 2
    if E <= tE:
        return E
    return tE


def _vmem_limit(phys, needed):
    return int(min(phys * 0.75, max(32 * 1024 * 1024, 2 * needed)))


# ------------------------------ pallas wrappers --------------------------------
def meshconv_pallas(f, w_flat, bias_col):
    """Plain tiled MeshConv. f: (B,5,C,E), w_flat: (O,5C), bias_col: (O,1) -> (B,O,E)."""
    B, K, C, E = f.shape
    O = w_flat.shape[0]

    phys = _physical_vmem_bytes()
    budget = min(int(phys * 0.5), 64 * 1024 * 1024)
    tE = _choose_tile_e(E, C, O, budget)
    n_e = pl.cdiv(E, tE)

    return pl.pallas_call(
        functools.partial(_meshconv_kernel, fuse_norm=False, residual=False),
        out_shape=jax.ShapeDtypeStruct((B, O, E), jnp.float32),
        grid=(B, n_e),
        in_specs=[
            pl.BlockSpec((1, K, C, tE), lambda b, e: (b, 0, 0, e)),
            pl.BlockSpec((O, K * C), lambda b, e: (0, 0)),
            pl.BlockSpec((O, 1), lambda b, e: (0, 0)),
        ],
        out_specs=pl.BlockSpec((1, O, tE), lambda b, e: (b, 0, e)),
        compiler_params=pltpu.CompilerParams(
            dimension_semantics=("parallel", "parallel"),
            vmem_limit_bytes=_vmem_limit(phys, _conv_tile_bytes(C, O, tE)),
        ),
    )(f, w_flat, bias_col)


def meshconv_fused_pallas(f, w_flat, bias_col, residual=None):
    """Fused MeshConv + InstanceNorm + (residual) + ReLU, one batch per grid step."""
    B, K, C, E = f.shape
    O = w_flat.shape[0]
    has_res = residual is not None

    in_specs = [
        pl.BlockSpec((1, K, C, E), lambda b: (b, 0, 0, 0)),
        pl.BlockSpec((O, K * C), lambda b: (0, 0)),
        pl.BlockSpec((O, 1), lambda b: (0, 0)),
    ]
    args = [f, w_flat, bias_col]
    if has_res:
        in_specs.append(pl.BlockSpec((1, O, E), lambda b: (b, 0, 0)))
        args.append(residual)

    phys = _physical_vmem_bytes()
    return pl.pallas_call(
        functools.partial(_meshconv_kernel, fuse_norm=True, residual=has_res),
        out_shape=jax.ShapeDtypeStruct((B, O, E), jnp.float32),
        grid=(B,),
        in_specs=in_specs,
        out_specs=pl.BlockSpec((1, O, E), lambda b: (b, 0, 0)),
        compiler_params=pltpu.CompilerParams(
            dimension_semantics=("parallel",),
            vmem_limit_bytes=_vmem_limit(phys, _fused_tile_bytes(C, O, E, has_res)),
        ),
    )(*args)


def instance_norm_relu_pallas(y, residual=None):
    """Fallback InstanceNorm + (residual) + ReLU. y: (B, O, E) -> (B, O, E)."""
    B, O, E = y.shape
    has_res = residual is not None
    in_specs = [pl.BlockSpec((1, O, E), lambda b: (b, 0, 0))]
    args = [y]
    if has_res:
        in_specs.append(pl.BlockSpec((1, O, E), lambda b: (b, 0, 0)))
        args.append(residual)
    return pl.pallas_call(
        functools.partial(_in_relu_kernel, residual=has_res),
        out_shape=jax.ShapeDtypeStruct((B, O, E), jnp.float32),
        grid=(B,),
        in_specs=in_specs,
        out_specs=pl.BlockSpec((1, O, E), lambda b: (b, 0, 0)),
        compiler_params=pltpu.CompilerParams(dimension_semantics=("parallel",)),
    )(*args)


# ------------------------------ JAX glue -------------------------------------
def pad_gemm_int(gemm_edges, edges_count, xsz):
    """(edges_count, 4) neighbor ids -> (1, xsz, 5) int32, edge id prepended,
    zero padded (matches MeshCNN's pad_gemm; indices stay int32 end-to-end)."""
    ids = jnp.arange(edges_count, dtype=jnp.int32)[:, None]
    pg = jnp.concatenate([ids, gemm_edges.astype(jnp.int32)], axis=1)    # (ec, 5)
    pg = jnp.pad(pg, ((0, xsz - edges_count), (0, 0)))
    return pg[None]                                                      # (1, xsz, 5)


def build_gemm_image(xs, gi):
    """Gather edge features by 1-ring indices, edges kept on the minor (lane) axis.
    xs: (B, C, E), gi: (B, E, 5) int32 -> (B, 5, C, E)."""
    B, C, E = xs.shape
    xp = jnp.concatenate([jnp.zeros((B, C, 1), xs.dtype), xs], axis=2)   # (B, C, E+1)
    idx = jnp.transpose(gi + 1, (0, 2, 1))                               # (B, 5, E), -1 -> 0
    f = jnp.take_along_axis(xp[:, None, :, :], idx[:, :, None, :], axis=3)
    return f                                                             # (B, 5, C, E)


def mesh_conv_layer(xs, gi, w_conv, bias, *, norm_relu=False, residual=None):
    """One MeshConv layer (+ optional fused InstanceNorm/residual/ReLU).
    xs: (B, C, E); gi: (B, E, 5) int32; w_conv: (O, C, 1, 5); bias: (O,)
    residual: (B, O, E) or None. Returns (B, O, E)."""
    B, C, E = xs.shape
    O, _, _, K = w_conv.shape
    f = build_gemm_image(xs, gi)                                         # (B, 5, C, E)
    # Conv2d weight (O, C, 1, K) -> (O, K, C) -> (O, K*C), matching the in-kernel
    # concat order [slot0 | slot1 | slot2 | slot3 | slot4] along the contraction axis.
    w_flat = jnp.transpose(w_conv[:, :, 0, :], (0, 2, 1)).reshape(O, K * C)
    b_col = bias[:, None]

    if not norm_relu:
        return meshconv_pallas(f, w_flat, b_col)

    phys = _physical_vmem_bytes()
    if _fused_tile_bytes(C, O, E, residual is not None) <= int(phys * 0.5):
        return meshconv_fused_pallas(f, w_flat, b_col, residual)
    # Mesh too large to fuse per-batch: edge-tiled conv, then norm/relu kernel.
    y = meshconv_pallas(f, w_flat, b_col)
    return instance_norm_relu_pallas(y, residual)


def demo_forward(x, gemm_list, counts, p):
    """A pool-free slice of MeshEncoderDecoder:
       Encoder  : DownConv(C_in -> C_hid, blocks=1, pool=0)
       Decoder  : final UpConv(C_hid -> C_out, transfer_data=False, blocks=0)
    x: (B, C_in, E, 1) -> (B, C_out, E, 1)."""
    xs = x[..., 0]                                                       # (B, C, E)
    E = xs.shape[2]
    gi = jnp.concatenate(
        [pad_gemm_int(ge, ec, E) for ge, ec in zip(gemm_list, counts)], 0)  # (B, E, 5)

    # ---- Encoder: DownConv ----
    x1 = mesh_conv_layer(xs, gi, p["down_w1"], p["down_b1"], norm_relu=True)
    x2 = mesh_conv_layer(x1, gi, p["down_w2"], p["down_b2"],
                         norm_relu=True, residual=x1)
    # TODO(synk): MeshPool / MeshUnpool (heap-driven topology edits) are host-side.

    # ---- Decoder: final UpConv (transfer_data=False) ----
    t = mesh_conv_layer(x2, gi, p["up_w"], p["up_b"], norm_relu=False)   # plain conv
    out = mesh_conv_layer(t, gi, p["upc1_w"], p["upc1_b"], norm_relu=True)
    return out[..., None]                                                # (B, C_out, E, 1)


# --------------------------- pure-JAX reference -------------------------------
def _reference_gather(xs, gi):
    B, C, E = xs.shape
    xp = jnp.concatenate([jnp.zeros((B, C, 1), xs.dtype), xs], axis=2)   # (B, C, E+1)
    xp_t = jnp.transpose(xp, (0, 2, 1))                                  # (B, E+1, C)
    return jax.vmap(lambda xb, gb: xb[gb])(xp_t, gi + 1)                 # (B, E, 5, C)


def ref_meshconv(xs, gi, w_conv, bias):
    f = _reference_gather(xs, gi)                                        # (B, E, 5, C)
    f = jnp.transpose(f, (0, 3, 1, 2))                                   # (B, C, E, 5)
    x1 = f[..., 1] + f[..., 3]
    x2 = f[..., 2] + f[..., 4]
    x3 = jnp.abs(f[..., 1] - f[..., 3])
    x4 = jnp.abs(f[..., 2] - f[..., 4])
    fimg = jnp.stack([f[..., 0], x1, x2, x3, x4], axis=3)                # (B, C, E, 5)
    return jnp.einsum("bces,ocs->boe", fimg, w_conv[:, :, 0, :]) + bias[None, :, None]


def ref_in_relu(y, residual=None):
    mean = jnp.mean(y, axis=2, keepdims=True)
    var = jnp.mean((y - mean) ** 2, axis=2, keepdims=True)
    z = (y - mean) * lax.rsqrt(var + _EPS)
    if residual is not None:
        z = z + residual
    return jnp.maximum(z, 0.0)


def demo_reference(x, gemm_list, counts, p):
    xs = x[..., 0]
    E = xs.shape[2]
    gi = jnp.concatenate(
        [pad_gemm_int(ge, ec, E) for ge, ec in zip(gemm_list, counts)], 0)
    x1 = ref_in_relu(ref_meshconv(xs, gi, p["down_w1"], p["down_b1"]))
    x2 = ref_in_relu(ref_meshconv(x1, gi, p["down_w2"], p["down_b2"]), residual=x1)
    t = ref_meshconv(x2, gi, p["up_w"], p["up_b"])
    out = ref_in_relu(ref_meshconv(t, gi, p["upc1_w"], p["upc1_b"]))
    return out[..., None]


# --------------------------------- main ---------------------------------------
if __name__ == "__main__":
    B, C_in, C_hid, C_out, E, K = 2, 4, 8, 4, 16, 5
    key = jax.random.PRNGKey(0)
    keys = jax.random.split(key, 11)

    # edge features, PyTorch shape (B, C_in, E, 1)
    x = jax.random.normal(keys[0], (B, C_in, E, 1), dtype=jnp.float32)

    def conv_params(kw, kb, o, c):
        w = 0.1 * jax.random.normal(kw, (o, c, 1, K), dtype=jnp.float32)
        b = 0.1 * jax.random.normal(kb, (o,), dtype=jnp.float32)
        return w, b

    down_w1, down_b1 = conv_params(keys[1], keys[2], C_hid, C_in)   # DownConv.conv1
    down_w2, down_b2 = conv_params(keys[3], keys[4], C_hid, C_hid)  # DownConv.conv2[0]
    up_w, up_b = conv_params(keys[5], keys[6], C_out, C_hid)        # final UpConv.up_conv
    upc1_w, upc1_b = conv_params(keys[7], keys[8], C_out, C_out)    # final UpConv.conv1
    params = {"down_w1": down_w1, "down_b1": down_b1,
              "down_w2": down_w2, "down_b2": down_b2,
              "up_w": up_w, "up_b": up_b,
              "upc1_w": upc1_w, "upc1_b": upc1_b}

    # synthetic mesh 1-ring structure: per-mesh (edges_count, 4) neighbor ids,
    # with -1 marking missing neighbors; second mesh is shorter to exercise padding
    counts = [E, E - 3]
    gemm0 = jax.random.randint(keys[9], (counts[0], 4), -1, counts[0], dtype=jnp.int32)
    gemm1 = jax.random.randint(keys[10], (counts[1], 4), -1, counts[1], dtype=jnp.int32)
    gemm_list = [gemm0, gemm1]

    out = demo_forward(x, gemm_list, counts, params)
    out = jax.block_until_ready(out)

    ref = demo_reference(x, gemm_list, counts, params)
    assert out.shape == (B, C_out, E, 1), out.shape
    assert jnp.allclose(out, ref, atol=1e-4, rtol=1e-4), "mismatch vs reference"

    print("KERNEL_OK")
</pallas_src>

<mosaic_0001>
module attributes {stable_mosaic.version = 11 : i64} {
  func.func @_meshconv_kernel(%arg0: i32, %arg1: memref<1x5x4x16xf32, #tpu.memory_space<vmem>>, %arg2: memref<8x20xf32, #tpu.memory_space<vmem>>, %arg3: memref<8x1xf32, #tpu.memory_space<vmem>>, %arg4: memref<1x8x16xf32, #tpu.memory_space<vmem>>) attributes {dimension_semantics = [#tpu.dimension_semantics<parallel>], iteration_bounds = array<i64: 2>, scalar_prefetch = 0 : i64, scratch_operands = 0 : i64, tpu.core_type = #tpu.core_type<tc>, window_params = [{transform_indices = @transform_0, window_bounds = array<i64: 1, 5, 4, 16>}, {pipeline_mode = #tpu.pipeline_mode<synchronous>, transform_indices = @transform_1, window_bounds = array<i64: 8, 20>}, {pipeline_mode = #tpu.pipeline_mode<synchronous>, transform_indices = @transform_2, window_bounds = array<i64: 8, 1>}, {transform_indices = @transform_3, window_bounds = array<i64: 1, 8, 16>}]} {
    %c0 = arith.constant 0 : index
    %c0_0 = arith.constant 0 : index
    %c0_1 = arith.constant 0 : index
    %c0_2 = arith.constant 0 : index
    %0 = vector.load %arg1[%c0, %c0_0, %c0_1, %c0_2] : memref<1x5x4x16xf32, #tpu.memory_space<vmem>>, vector<1x5x4x16xf32>
    %1 = vector.shape_cast %0 : vector<1x5x4x16xf32> to vector<5x4x16xf32>
    %2 = vector.extract_strided_slice %1 {offsets = [0, 0, 0], sizes = [1, 4, 16], strides = [1, 1, 1]} : vector<5x4x16xf32> to vector<1x4x16xf32>
    %3 = vector.shape_cast %2 : vector<1x4x16xf32> to vector<4x16xf32>
    %4 = vector.extract_strided_slice %1 {offsets = [1, 0, 0], sizes = [1, 4, 16], strides = [1, 1, 1]} : vector<5x4x16xf32> to vector<1x4x16xf32>
    %5 = vector.shape_cast %4 : vector<1x4x16xf32> to vector<4x16xf32>
    %6 = vector.extract_strided_slice %1 {offsets = [3, 0, 0], sizes = [1, 4, 16], strides = [1, 1, 1]} : vector<5x4x16xf32> to vector<1x4x16xf32>
    %7 = vector.shape_cast %6 : vector<1x4x16xf32> to vector<4x16xf32>
    %8 = arith.addf %5, %7 : vector<4x16xf32>
    %9 = vector.extract_strided_slice %1 {offsets = [2, 0, 0], sizes = [1, 4, 16], strides = [1, 1, 1]} : vector<5x4x16xf32> to vector<1x4x16xf32>
    %10 = vector.shape_cast %9 : vector<1x4x16xf32> to vector<4x16xf32>
    %11 = vector.extract_strided_slice %1 {offsets = [4, 0, 0], sizes = [1, 4, 16], strides = [1, 1, 1]} : vector<5x4x16xf32> to vector<1x4x16xf32>
    %12 = vector.shape_cast %11 : vector<1x4x16xf32> to vector<4x16xf32>
    %13 = arith.addf %10, %12 : vector<4x16xf32>
    %14 = vector.extract_strided_slice %1 {offsets = [1, 0, 0], sizes = [1, 4, 16], strides = [1, 1, 1]} : vector<5x4x16xf32> to vector<1x4x16xf32>
    %15 = vector.shape_cast %14 : vector<1x4x16xf32> to vector<4x16xf32>
    %16 = vector.extract_strided_slice %1 {offsets = [3, 0, 0], sizes = [1, 4, 16], strides = [1, 1, 1]} : vector<5x4x16xf32> to vector<1x4x16xf32>
    %17 = vector.shape_cast %16 : vector<1x4x16xf32> to vector<4x16xf32>
    %18 = arith.subf %15, %17 : vector<4x16xf32>
    %19 = math.absf %18 : vector<4x16xf32>
    %20 = vector.extract_strided_slice %1 {offsets = [2, 0, 0], sizes = [1, 4, 16], strides = [1, 1, 1]} : vector<5x4x16xf32> to vector<1x4x16xf32>
    %21 = vector.shape_cast %20 : vector<1x4x16xf32> to vector<4x16xf32>
    %22 = vector.extract_strided_slice %1 {offsets = [4, 0, 0], sizes = [1, 4, 16], strides = [1, 1, 1]} : vector<5x4x16xf32> to vector<1x4x16xf32>
    %23 = vector.shape_cast %22 : vector<1x4x16xf32> to vector<4x16xf32>
    %24 = arith.subf %21, %23 : vector<4x16xf32>
    %25 = math.absf %24 : vector<4x16xf32>
    %26 = tpu.concatenate %3, %8, %13, %19, %25 in 0 : vector<4x16xf32>, vector<4x16xf32>, vector<4x16xf32>, vector<4x16xf32>, vector<4x16xf32> -> vector<20x16xf32>
    %c0_3 = arith.constant 0 : index
    %c0_4 = arith.constant 0 : index
    %27 = vector.load %arg2[%c0_3, %c0_4] : memref<8x20xf32, #tpu.memory_space<vmem>>, vector<8x20xf32>
    %cst = arith.constant dense<0.000000e+00> : vector<8x16xf32>
    %28 = tpu.matmul %27, %26, %cst {dimension_numbers = #tpu.dot_dimension_numbers<[1], [0], [0], [1], [0, 0, 1, 1], [], []>} : vector<8x20xf32>, vector<20x16xf32>, vector<8x16xf32> -> vector<8x16xf32>
    %c0_5 = arith.constant 0 : index
    %c0_6 = arith.constant 0 : index
    %29 = vector.load %arg3[%c0_5, %c0_6] : memref<8x1xf32, #tpu.memory_space<vmem>>, vector<8x1xf32>
    %30 = vector.broadcast %29 : vector<8x1xf32> to vector<8x16xf32>
    %31 = arith.addf %28, %30 : vector<8x16xf32>
    %cst_7 = arith.constant dense<0.000000e+00> : vector<8xf32>
    %32 = vector.multi_reduction <add>, %31, %cst_7 [1] : vector<8x16xf32> to vector<8xf32>
    %33 = vector.shape_cast %32 : vector<8xf32> to vector<8x1xf32>
    %cst_8 = arith.constant 1.600000e+01 : f32
    %34 = vector.broadcast %cst_8 : f32 to vector<8x1xf32>
    %35 = arith.divf %33, %34 : vector<8x1xf32>
    %36 = vector.broadcast %35 : vector<8x1xf32> to vector<8x16xf32>
    %37 = arith.subf %31, %36 : vector<8x16xf32>
    %38 = arith.mulf %37, %37 : vector<8x16xf32>
    %cst_9 = arith.constant dense<0.000000e+00> : vector<8xf32>
    %39 = vector.multi_reduction <add>, %38, %cst_9 [1] : vector<8x16xf32> to vector<8xf32>
    %40 = vector.shape_cast %39 : vector<8xf32> to vector<8x1xf32>
    %cst_10 = arith.constant 1.600000e+01 : f32
    %41 = vector.broadcast %cst_10 : f32 to vector<8x1xf32>
    %42 = arith.divf %40, %41 : vector<8x1xf32>
    %cst_11 = arith.constant 9.99999974E-6 : f32
    %43 = vector.broadcast %cst_11 : f32 to vector<8x1xf32>
    %44 = arith.addf %42, %43 : vector<8x1xf32>
    %45 = math.rsqrt %44 : vector<8x1xf32>
    %46 = vector.broadcast %45 : vector<8x1xf32> to vector<8x16xf32>
    %47 = arith.mulf %37, %46 : vector<8x16xf32>
    %cst_12 = arith.constant 0.000000e+00 : f32
    %48 = vector.broadcast %cst_12 : f32 to vector<8x16xf32>
    %49 = arith.maximumf %47, %48 : vector<8x16xf32>
    %c0_13 = arith.constant 0 : index
    %c0_14 = arith.constant 0 : index
    %c0_15 = arith.constant 0 : index
    %50 = vector.load %arg4[%c0_13, %c0_14, %c0_15] : memref<1x8x16xf32, #tpu.memory_space<vmem>>, vector<1x8x16xf32>
    %51 = vector.shape_cast %50 : vector<1x8x16xf32> to vector<8x16xf32>
    %52 = vector.shape_cast %49 : vector<8x16xf32> to vector<1x8x16xf32>
    tpu.vector_store %arg4[%c0_13, %c0_14, %c0_15], %52 {strides = array<i32>} : memref<1x8x16xf32, #tpu.memory_space<vmem>>, vector<1x8x16xf32>,
    return
  }
  func.func @transform_0(%arg0: i32) -> (i32, i32, i32, i32) {
    %c0_i32 = arith.constant 0 : i32
    %c0_i32_0 = arith.constant 0 : i32
    %c0_i32_1 = arith.constant 0 : i32
    %c0_i32_2 = arith.constant 0 : i32
    return %arg0, %c0_i32, %c0_i32_0, %c0_i32_1 : i32, i32, i32, i32
  }
  func.func @transform_1(%arg0: i32) -> (i32, i32) {
    %c0_i32 = arith.constant 0 : i32
    %c0_i32_0 = arith.constant 0 : i32
    %c0_i32_1 = arith.constant 0 : i32
    return %c0_i32, %c0_i32_0 : i32, i32
  }
  func.func @transform_2(%arg0: i32) -> (i32, i32) {
    %c0_i32 = arith.constant 0 : i32
    %c0_i32_0 = arith.constant 0 : i32
    %c0_i32_1 = arith.constant 0 : i32
    return %c0_i32, %c0_i32_0 : i32, i32
  }
  func.func @transform_3(%arg0: i32) -> (i32, i32, i32) {
    %c0_i32 = arith.constant 0 : i32
    %c0_i32_0 = arith.constant 0 : i32
    %c0_i32_1 = arith.constant 0 : i32
    return %arg0, %c0_i32, %c0_i32_0 : i32, i32, i32
  }
}

</mosaic_0001>

<bundles_post_ra>
// kernel: tpu_custom_call.1
= control target key start
LH: loop header
LB: loop body
LE: loop exit
PB: predicated region body
PF: predicated region fallthrough
CT: control target
= control target key end

     0   :  { %8 = vsyncpa [#allocation3], 0  ;;  %s741_s0 = inlined_call_operand.hbm [shape: f32[2,5,4,16], index: 0, kind: input, shape index: {}]   ;;  %s742_s1 = inlined_call_operand.vmem [shape: f32[8,20], index: 1, kind: input, shape index: {}]   ;;  %s743_s2 = inlined_call_operand.vmem [shape: f32[8,1], index: 2, kind: input, shape index: {}]   ;;  %s744_s3 = inlined_call_operand.hbm [shape: f32[2,8,16], index: 3, kind: output, shape index: {}]  }
   0x1   :  { %10 = vsyncpa [#allocation3 + $0x1], 0 }
   0x2   :  { %11 = vsyncpa [#allocation4], 0 }
   0x3   :  { %13 = vsyncpa [#allocation4 + $0x1], 0  ;;  %s597_s12 = smov 0   ;;  %s599_s13 = smov 0  }
   0x4   :  { %s601_s14 = smov 0   ;;  %s603_s15 = smov 0  }
   0x5 LB: > { %s618_s16 = sadd.s32 4294967295, %s568_s15   ;;  %s394_s17 = sadd.s32 4294967294, %s568_s15   ;;  %s568_s15 = sphi %s603_s15, %s758_s15   ;;  %s564_s14 = sphi %s601_s14, %s757_s14   ;;  %s560_s13 = sphi %s599_s13, %s756_s13   ;;  %s556_s12 = sphi %s597_s12, %s755_s12  }
   0x6   : > { %s622_s18 = sadd.s32 1, %s568_s15   ;;  %s26_s19 = sadd.s32 1, %s564_s14 }
   0x7   : > { %s23_s20 = ssub.s32 %s568_s15, %s622_s18  ;;  %p33_p0 = scmp.ne.s32.totalorder %s564_s14, %s560_s13 }
   0x8   : > { %p24_p1 = scmp.eq.s32.totalorder %s23_s20, 0  ;;  %p34_p2 = scmp.eq.s32.totalorder %s568_s15, 0 }
   0x9   : > { %p39_p3 = scmp.ne.s32.totalorder %s560_s13, %s556_s12  ;;  %p40_p4 = scmp.eq.s32.totalorder %s618_s16, 0 }
   0xa   : > { %s634_s21 = scalar_select %p24_p1, %s564_s14, %s26_s19  }
   0xb   : > { %p35_p5 = por %p34_p2, %p33_p0  ;;  %p636_p6 = por %p40_p4, %p39_p3 }
   0xc   : > { %p105_p7 = scmp.eq.s32.totalorder %s618_s16, 1  ;;  %p111_p8 = scmp.eq.s32.totalorder %s394_s17, 1 }
   0xd   : > { %s747_s22 = scalar_select %p636_p6, 1, 0 }
   0xe   : > { %p434_p10 = scmp.lt.s32.totalorder %s568_s15, 2  ;;  %p643_p11 = por %p105_p7, %p33_p0 }
   0xf   : > { %p647_p12 = por %p111_p8, %p39_p3  ;;  %s137_s25 = sand.u32 1, %s564_s14  }
  0x10   : > { %s748_s23 = scalar_select %p643_p11, 1, 0 }
  0x11   : > { %s749_s24 = scalar_select %p647_p12, 1, 0 }
  0x12   : > { %s420_s26 = smul.u32 320, %s568_s15  ;;  %p658_p13 = pnand %p434_p10, %p35_p5 }
  0x13   : > { %s419_s27 = smul.u32 20, %s137_s25  ;;  %s664_s7 = scalar_lea.sflag [#allocation3], %s137_s25 }
  0x14   : > { %s656_s30 = scalar_lea.hbm %s741_s0, %s420_s26  ;;  %p478_p1 = pneg %p658_p13 }
  0x15   : > { %s141_s5 = scalar_lea.vmem [#allocation2], %s419_s27  ;;  %s476_s8 = scalar_lea.hbm %s656_s30, 320 }
  0x16   : > { %s148_s6 = sshll.u32 %s141_s5, 4  ;;  %p477_p0 = scmp.ne.s32.totalorder %s656_s30, %s476_s8  ;;  %s662_s6 = int_to_ptr.vmem [resolvable:$true] %s148_s6 }
  0x17   : > { %s481_s11 = scalar_lea.hbm %s741_s0, 640  ;;  %p482_p4 = scmp.lt.s32.totalorder %s656_s30, %s741_s0 }
  0x18   : > { %p479_p2 = pnand %p478_p1, %p477_p0  ;;  %p483_p5 = scmp.lt.s32.totalorder %s481_s11, %s476_s8 }
  0x1a   : > { %p480_p3 = pneg %p479_p2  ;;  %p484_p7 = por %p483_p5, %p482_p4 }
  0x1c   : > { %p485_p8 = pnand %p484_p7, %p480_p3 }
  0x1e   : > { %488 = shalt.err (!%p485_p8)
}
  0x1f   : > { %s489_s20 = scalar_lea.vmem %s662_s6, 320  ;;  %s570_s25 = smov [#allocation2]  }
  0x20   : > { %p490_p10 = scmp.ne.s32.totalorder %s662_s6, %s489_s20  ;;  %s494_s26 = sshll.u32 %s570_s25, 4  ;;  %s495_s26 = int_to_ptr.vmem [resolvable:$false] %s494_s26 }
  0x21   : > { %s496_s27 = scalar_lea.vmem %s495_s26, 640  ;;  %p497_p2 = scmp.lt.s32.totalorder %s662_s6, %s495_s26 }
  0x22   : > { %p492_p9 = pnand %p490_p10, %p478_p1  ;;  %p498_p12 = scmp.lt.s32.totalorder %s496_s27, %s489_s20 }
  0x24   : > { %p493_p0 = pneg %p492_p9  ;;  %p499_p11 = por %p498_p12, %p497_p2 }
  0x26   : > { %p500_p6 = pnand %p499_p11, %p493_p0 }
  0x28   : > { %503 = shalt.err (!%p500_p6)
}
  0x29   : > { %s571_s28 = smov 64   ;;  %s572_s29 = smov 4  }
  0x2a   : > { %429 = dma.hbm_to_vmem [thread:$0]  (!%p658_p13), %s656_s30, 320, %s662_s6, %s664_s7, %s571_s28, %s571_s28, %s572_s29  }
  0x2b   : > { %p398_p9 = scmp.ge.s32.totalorder %s568_s15, 1  ;;  %p156_p1 = scmp.lt.s32.totalorder %s568_s15, 3 }
  0x2d   : > { %p157_p3 = pnand %p398_p9, %p156_p1 }
  0x2e   : > { %s688_s5 = sand.u32 (!%p157_p3), 1, %s560_s13   ;;  %p751_p6 = scmp.ne.s32.totalorder (!%p157_p3), %s747_s22, 0 }
  0x2f   : > { %160 = sbr.rel (%p157_p3) target bundleno = 579 (0x243), region = 32  ;;  %s163_s9 = scalar_lea.sflag (!%p157_p3), [#allocation3], %s688_s5 }
  0x30   : > { %s421_s8 = smul.u32 (!%p157_p3), 20, %s688_s5 }
  0x32   : > { %s166_s10 = scalar_lea.vmem (!%p157_p3), [#allocation2], %s421_s8 }
  0x34   : > { %547 = dma.done.wait (%p751_p6), %s163_s9, 320  }
  0x35   : > { %549 = vsyncadd (%p751_p6), %s163_s9, 4294966976  ;;  %v573_v0 = vmov 0.0   ;;  %vm574_vm0 = vmmov 0   ;;  %v575_v1 = vmov 0   ;;  %v191_v2 = vld [vmem:[%s166_s10 + $0x8] sm:$0xf] }
  0x36   : > { %410 = vmatprep.subr.mxu0 %v573_v0  ;;  %416 = vmatprep.mubr.msk.f32.mxu0 %vm574_vm0, %v573_v0  ;;  %v193_v3 = vld [vmem:[%s166_s10 + $0x10] sm:$0xf]  ;;  %v190_v4 = vld [vmem:[%s166_s10 + $0x4] sm:$0xf]  ;;  %v192_v6 = vld [vmem:[%s166_s10 + $0xc] sm:$0xf] }
  0x37   : > { %473 = vset.pattern.permute.xlu0 %v575_v1  ;;  %v198_v5 = vsub.f32 %v191_v2, %v193_v3  ;;  %vm206_vm1 = vcmask 1043456   ;;  %v196_v7 = vsub.f32 %v190_v4, %v192_v6  ;;  %v194_v8 = vadd.f32 %v192_v6, %v190_v4  ;;  %v210_v9 = vld [vmem:[%s743_s2] sm:$0xff]  ;;  %s399_s7 = sshll.u32 %s688_s5, 3  ;;  %s403_s11 = sshll.u32 %s618_s16, 7 }
  0x38   : > { %213 = vperm.xlu0 %473, %v210_v9   ;;  %v195_v11 = vadd.f32 %v193_v3, %v191_v2  ;;  %v189_v14 = vld [vmem:[%s166_s10] sm:$0xf]  ;;  %vm216_vm2 = vcmask 162816   ;;  %vm293_vm3 = vcmask 130048   ;;  %s188_s17 = scalar_lea.vmem [#allocation5], %s399_s7  ;;  %s322_s26 = scalar_lea.hbm %s744_s3, %s403_s11 }
  0x39   : > { %v199_v10 = vand.u32 2147483647, %v198_v5  ;;  %v197_v12 = vand.u32 2147483647, %v196_v7  ;;  %v201_v13 = vrot.slane %v194_v8, 4  ;;  %v209_v18 = vld [vmem:[%s742_s1] sm:$0xff] }
  0x3a   : > { %s324_s19 = sshll.u32 %s188_s17, 4  ;;  %s311_s27 = scalar_lea.sflag [#allocation4], %s688_s5  ;;  %s325_s19 = int_to_ptr.vmem [resolvable:$true] %s324_s19 }
  0x3b   : > { %411 = vmatpush3.msk.msra.mxu0 %vm206_vm1, %v199_v10  ;;  %v204_v15 = vrot.slane %v197_v12, 4  ;;  %v207_v17 = vsel %vm206_vm1, %v189_v14, %v201_v13  ;;  %s504_s28 = scalar_lea.vmem %s325_s19, 128  ;;  %p752_p12 = scmp.ne.s32.totalorder %s748_s23, 0 }
  0x3c   : > { %412 = vmatprep.subr.mxu0 %v573_v0  ;;  %p505_p11 = scmp.ne.s32.totalorder %s325_s19, %s504_s28  ;;  %s576_s29 = smov [#allocation5]  }
  0x3d   : > { %v208_v16 = vsel %vm206_vm1, %v195_v11, %v204_v15  ;;  %s508_s8 = sshll.u32 %s576_s29, 4  ;;  %s509_s8 = int_to_ptr.vmem [resolvable:$false] %s508_s8 }
  0x3e   : > { %413 = vmatpush3.msra.mxu0 %v208_v16  ;;  %p506_p13 = pnand %p505_p11, %p752_p12  ;;  %s510_s16 = scalar_lea.vmem %s509_s8, 256 }
  0x3f   : > { %414 = vmatprep.subr.mxu0 %v573_v0  ;;  %p511_p5 = scmp.lt.s32.totalorder %s325_s19, %s509_s8  ;;  %p512_p7 = scmp.lt.s32.totalorder %s510_s16, %s504_s28 }
  0x40   : > { %415 = vmatpush3.msra.mxu0 %v207_v17  ;;  %p507_p4 = pneg %p506_p13 }
  0x41   : > { %417 = vmatmul.mubr.msk.f32.vlgmr.msra.gmra.mxu0 %vm216_vm2, %v209_v18  ;;  %p513_p8 = por %p512_p7, %p511_p5 }
  0x43   : > { %p514_p10 = pnand %p513_p8, %p507_p4 }
  0xb3   : > { %v214_v19 = vpop.permute.xlu0 %213 }
 0x101   : > { %v289_v20 = vpop.f32.mrf.mxu0 }
 0x102   : > { %v290_v21 = vadd.f32 %v289_v20, %v214_v19 }
 0x103   : > { %v418_v22 = vpop.f32.mrf.mxu0 }
 0x104   : > { %v294_v23 = vsel %vm293_vm3, %v290_v21, 0.0 }
 0x105   : > { %295 = vadd.xlane.f32.xlu0 %v294_v23 }
 0x18e   : > { %v296_v24 = vpop.xlane.xlu0 %295 }
 0x18f   : > { %v298_v25 = vmul.f32 0.0625, %v296_v24 }
 0x191   : > { %v299_v26 = vsub.f32 %v290_v21, %v298_v25 }
 0x193   : > { %v300_v27 = vmul.f32 %v299_v26, %v299_v26 }
 0x195   : > { %v301_v28 = vsel %vm293_vm3, %v300_v27, 0.0 }
 0x196   : > { %302 = vadd.xlane.f32.xlu1 %v301_v28 }
 0x21f   : > { %v303_v29 = vpop.xlane.xlu1 %302 }
 0x220   : > { %v304_v30 = vmul.f32 0.0625, %v303_v29 }
 0x222   : > { %v305_v31 = vadd.f32 1e-05, %v304_v30 }
 0x224   : > { %474 = vrsqrt.f32 %v305_v31 }
 0x231   : > { %v475_v32 = vpop.eup %474 }
 0x232   : > { %v307_v33 = vmul.f32 %v475_v32, %v299_v26 }
 0x234   : > { %v308_v34 = vmax.f32 %v307_v33, 0.0 }
 0x236   : > { %309 = vst.msk [vmem:[%s188_s17] sm:$0xff] %vm293_vm3, %v308_v34 }
 0x237   : > { %517 = shalt.err (!%p514_p10)
}
 0x238   : > { %s518_s9 = scalar_lea.hbm %s322_s26, 128  ;;  %s522_s30 = scalar_lea.hbm %s744_s3, 256 }
 0x239   : > { %p519_p0 = scmp.ne.s32.totalorder %s322_s26, %s518_s9  ;;  %p523_p1 = scmp.lt.s32.totalorder %s322_s26, %s744_s3 }
 0x23a   : > { %p524_p3 = scmp.lt.s32.totalorder %s522_s30, %s518_s9 }
 0x23b   : > { %p520_p2 = pnand %p519_p0, %p752_p12 }
 0x23c   : > { %p525_p6 = por %p524_p3, %p523_p1 }
 0x23d   : > { %p521_p9 = pneg %p520_p2 }
 0x23f   : > { %p526_p11 = pnand %p525_p6, %p521_p9 }
 0x241   : > { %529 = shalt.err (!%p526_p11)
}
 0x242   : > { %424 = dma.vmem_to_hbm [thread:$0]  (%p752_p12), %s325_s19, 128, %s322_s26, %s311_s27  }
 0x243 PF: > { %s336_s6 = sand.u32 1, %s556_s12   ;;  %p753_p13 = scmp.ne.s32.totalorder %s749_s24, 0 }
 0x244   : > { %p754_p4 = scmp.ge.s32.totalorder %s568_s15, 2  ;;  %s337_s7 = scalar_lea.sflag [#allocation4], %s336_s6 }
 0x246   : > { %p431_p5 = pnand %p754_p4, %p753_p13 }
 0x248   : > { %p432_p7 = pneg %p431_p5 }
 0x24a   : > { %551 = dma.done.wait (%p432_p7), %s337_s7, 128  }
 0x24b   : > { %553 = vsyncadd (%p432_p7), %s337_s7, 4294967168  ;;  %p16_p8 = scmp.ge.s32.totalorder %s622_s18, 4   ;;  %s755_s12 = smov %s560_s13 }
 0x24c   : > { %s756_s13 = smov %s564_s14  ;;  %s757_s14 = smov %s634_s21 }
 0x24d   : > { %s758_s15 = smov %s622_s18  ;;  %18 = sbr.rel (!%p16_p8) target bundleno = 5 (0x5), region = 77 }
 0x252   :  { %342 = vsyncpa [#allocation3], 1 }
 0x253   :  { %344 = vsyncpa [#allocation3 + $0x1], 1 }
 0x254   :  { %345 = vsyncpa [#allocation4], 1 }
 0x255   :  { %347 = vsyncpa [#allocation4 + $0x1], 1 }

</bundles_post_ra>
